<compile_context>
chip_gen: v7x
topology: tpu7x:2x2x1
jax: 0.10.0
libtpu: 0.0.40
codegen_flags: <defaults>
</compile_context>

<pallas_src>
import jax
import jax.numpy as jnp
from jax.experimental import pallas as pl
from jax.experimental.pallas import tpu as pltpu

# Hyperparameter defaults from CycleGANLoss.__init__.
FACTOR_CYCLE_A = 0.1
FACTOR_CYCLE_B = 0.1
FACTOR_IDT_A = 0.001
FACTOR_IDT_B = 0.001

_MAX_TILE_ROWS = 1024   # (1024,128) f32 x 6 inputs x 2 buffers ~ 6 MiB + 1 MiB scratch


def _cdiv(a, b):
    return -(-a // b)


def _round_up(a, b):
    return _cdiv(a, b) * b


def _rows128(x):
    """Flatten row-major into a lane-dense (rows, 128) slab in the NATIVE dtype.

    Copy-free (pure contiguous reshape) when numel % 1024 == 0 — the common case for
    image tensors; otherwise only the tail is zero-padded (exact for the squared
    difference terms since both operands get identical zero padding).
    """
    flat = x.reshape(-1)
    pad = (-flat.shape[0]) % 128
    if pad:
        flat = jnp.pad(flat, (0, pad))
    arr = flat.reshape(-1, 128)
    rpad = (-arr.shape[0]) % 8
    if rpad:
        arr = jnp.pad(arr, ((0, rpad), (0, 0)))
    return arr


def _make_cyclegan_kernel(img_numel, disc_numel, rows_p, tile_rows,
                          fca, fcb, fia, fib):
    inv_img = 1.0 / float(img_numel)
    inv_disc = 1.0 / float(disc_numel)
    ragged = (rows_p % tile_rows) != 0           # last tile reads past the array -> mask
    merged = (fca == fcb) and (fia == fib)       # default factors are pairwise equal
    if merged:
        wca, wcb, wia, wib = 1.0, 1.0, 1.0, 1.0  # factors folded into the epilogue
        out_fc, out_fi = float(fca), float(fia)
    else:
        wca, wcb, wia, wib = float(fca), float(fcb), float(fia), float(fib)
        out_fc, out_fi = 1.0, 1.0

    def kernel(a_ref, rA_ref, iA_ref, b_ref, rB_ref, iB_ref,
               pA_ref, pB_ref, dA_ref, dB_ref, out_ref, acc_ref):
        i = pl.program_id(0)

        @pl.when(i == 0)
        def _init():
            acc_ref[...] = jnp.zeros_like(acc_ref)

        # ---- hot loop: VPU-only elementwise accumulation, no XLU, no divides ----
        # In-kernel upcast so HBM traffic stays in the caller's dtype (bf16 friendly).
        if ragged:
            nvalid = rows_p - i * tile_rows
            row_ids = jax.lax.broadcasted_iota(jnp.int32, (tile_rows, 128), 0)
            keep = row_ids < nvalid

            def load(ref):
                return jnp.where(keep, ref[...].astype(jnp.float32), 0.0)
        else:
            def load(ref):
                return ref[...].astype(jnp.float32)

        def sqd(x, y, w):
            d = x - y
            d2 = d * d
            return d2 if w == 1.0 else d2 * w

        a = load(a_ref)
        b = load(b_ref)
        acc_ref[0] += sqd(a, load(rA_ref), wca) + sqd(b, load(rB_ref), wcb)   # cycle
        acc_ref[1] += sqd(a, load(iA_ref), wia) + sqd(b, load(iB_ref), wib)   # identity

        # ---- epilogue (runs once): cross-lane reduces, factors and 1/numel folded ----
        @pl.when(i == pl.num_programs(0) - 1)
        def _finalize():
            img_part = (out_fc * jnp.sum(acc_ref[0])
                        + out_fi * jnp.sum(acc_ref[1])) * inv_img

            # Tiny PatchGAN discriminator terms, masked to the true element count so
            # zero padding does not pollute the |x - 1| sums.
            d_rows = pA_ref.shape[0]
            ridx = jax.lax.broadcasted_iota(jnp.int32, (d_rows, 128), 0)
            cidx = jax.lax.broadcasted_iota(jnp.int32, (d_rows, 128), 1)
            dvalid = (ridx * 128 + cidx) < disc_numel

            def msum(x):
                return jnp.sum(jnp.where(dvalid, x, 0.0))

            pA = pA_ref[...].astype(jnp.float32)   # disc(fake A) == pred_genA
            pB = pB_ref[...].astype(jnp.float32)   # disc(fake B) == pred_genB
            dA = dA_ref[...].astype(jnp.float32)   # disc(real A)
            dB = dB_ref[...].astype(jnp.float32)   # disc(real B)
            disc_part = (msum(jnp.abs(pA - 1.0))                                  # loss_g_a
                         + msum(jnp.abs(pB - 1.0))                                # loss_g_b
                         + 0.5 * (msum(jnp.abs(dA - 1.0)) + msum(jnp.abs(pA)))    # c_loss_a
                         + 0.5 * (msum(jnp.abs(dB - 1.0)) + msum(jnp.abs(pB)))    # c_loss_b
                         ) * inv_disc

            out_ref[...] = jnp.broadcast_to(img_part + disc_part,
                                            out_ref.shape).astype(out_ref.dtype)

    return kernel


def cyclegan_loss(data, fakeA, fakeB, reconstructedA, reconstructedB,
                  idtA, idtB, discA, discB, disc_fakeA, disc_fakeB,
                  *, factor_cycle_a=FACTOR_CYCLE_A, factor_cycle_b=FACTOR_CYCLE_B,
                  factor_idt_a=FACTOR_IDT_A, factor_idt_b=FACTOR_IDT_B,
                  tile_rows=None):
    """Mirrors CycleGANLoss.forward with reduction='sum'.

    `fakeA` / `fakeB` are only consumed by the (absent) discriminator modules, so they
    are unused here — discriminator predictions arrive via `disc_fakeA` / `disc_fakeB`,
    exactly as the PyTorch module allows.
    """
    batch_a, batch_b = data[0], data[1]

    img_numel = batch_a.size
    disc_numel = disc_fakeA.size
    assert (batch_b.size == img_numel and reconstructedA.size == img_numel
            and reconstructedB.size == img_numel and idtA.size == img_numel
            and idtB.size == img_numel)
    assert (disc_fakeB.size == disc_numel and discA.size == disc_numel
            and discB.size == disc_numel)

    # Lane-dense (rows,128) views — pure reshapes in the common case, native dtype kept.
    a = _rows128(batch_a)
    rA = _rows128(reconstructedA)
    iA = _rows128(idtA)
    b = _rows128(batch_b)
    rB = _rows128(reconstructedB)
    iB = _rows128(idtB)
    rows_p = a.shape[0]

    pA = _rows128(disc_fakeA)
    pB = _rows128(disc_fakeB)
    dA = _rows128(discA)
    dB = _rows128(discB)
    d_rows_p = pA.shape[0]

    # Tile sizing: number of steps first, then an (8-aligned) tile that just covers the
    # rows — no padding up to a multiple of the tile (ragged last tile is masked).
    if tile_rows is None:
        n_i = _cdiv(rows_p, _MAX_TILE_ROWS)
        tile_rows = _round_up(_cdiv(rows_p, n_i), 8)
    else:
        tile_rows = _round_up(int(tile_rows), 8)
    tile_rows = min(tile_rows, rows_p)
    n_i = _cdiv(rows_p, tile_rows)

    kernel = _make_cyclegan_kernel(img_numel, disc_numel, rows_p, tile_rows,
                                   factor_cycle_a, factor_cycle_b,
                                   factor_idt_a, factor_idt_b)

    img_spec = pl.BlockSpec((tile_rows, 128), lambda i: (i, 0))
    disc_spec = pl.BlockSpec((d_rows_p, 128), lambda i: (0, 0))   # resident, tiny

    out = pl.pallas_call(
        kernel,
        out_shape=jax.ShapeDtypeStruct((8, 128), jnp.float32),
        grid_spec=pltpu.PrefetchScalarGridSpec(
            num_scalar_prefetch=0,
            grid=(n_i,),
            in_specs=[img_spec] * 6 + [disc_spec] * 4,
            out_specs=pl.BlockSpec((8, 128), lambda i: (0, 0)),
            scratch_shapes=[pltpu.VMEM((2, tile_rows, 128), jnp.float32)],
        ),
        compiler_params=pltpu.CompilerParams(
            dimension_semantics=("arbitrary",),
            vmem_limit_bytes=32 * 1024 * 1024,
        ),
    )(a, rA, iA, b, rB, iB, pA, pB, dA, dB)

    return out[0, 0]


def _reference_loss(data, reconstructedA, reconstructedB, idtA, idtB,
                    discA, discB, disc_fakeA, disc_fakeB):
    a, b = data[0].astype(jnp.float32), data[1].astype(jnp.float32)
    pA, pB = disc_fakeA.astype(jnp.float32), disc_fakeB.astype(jnp.float32)
    dA, dB = discA.astype(jnp.float32), discB.astype(jnp.float32)
    loss_g_a = jnp.mean(jnp.abs(pA - 1.0))
    loss_rec_a = jnp.mean((a - reconstructedA.astype(jnp.float32)) ** 2)
    loss_idt_a = jnp.mean((a - idtA.astype(jnp.float32)) ** 2)
    c_loss_a = (jnp.mean(jnp.abs(dA - 1.0)) + jnp.mean(jnp.abs(pA))) * 0.5
    loss_g_b = jnp.mean(jnp.abs(pB - 1.0))
    loss_rec_b = jnp.mean((b - reconstructedB.astype(jnp.float32)) ** 2)
    loss_idt_b = jnp.mean((b - idtB.astype(jnp.float32)) ** 2)
    c_loss_b = (jnp.mean(jnp.abs(dB - 1.0)) + jnp.mean(jnp.abs(pB))) * 0.5
    return (loss_g_a + FACTOR_CYCLE_A * loss_rec_a + FACTOR_IDT_A * loss_idt_a + c_loss_a
            + loss_g_b + FACTOR_CYCLE_B * loss_rec_b + FACTOR_IDT_B * loss_idt_b + c_loss_b)


if __name__ == "__main__":
    B, C, H, W = 2, 4, 16, 32        # image tensors (NCHW) -> 4096 elems -> 32 rows of 128
    PB, PC, PH, PW = 2, 1, 7, 9      # discriminator (PatchGAN-style) output -> 126 elems

    key = jax.random.PRNGKey(0)
    ks = jax.random.split(key, 11)

    data = jax.random.normal(ks[0], (2, B, C, H, W), jnp.float32)   # stacked (A, B)
    fakeA = jax.random.normal(ks[1], (B, C, H, W), jnp.float32)     # unused (disc preds given)
    fakeB = jax.random.normal(ks[2], (B, C, H, W), jnp.float32)     # unused
    reconstructedA = jax.random.normal(ks[3], (B, C, H, W), jnp.float32)
    reconstructedB = jax.random.normal(ks[4], (B, C, H, W), jnp.float32)
    idtA = jax.random.normal(ks[5], (B, C, H, W), jnp.float32)
    idtB = jax.random.normal(ks[6], (B, C, H, W), jnp.float32)
    discA = jax.random.normal(ks[7], (PB, PC, PH, PW), jnp.float32)       # disc(real A)
    discB = jax.random.normal(ks[8], (PB, PC, PH, PW), jnp.float32)       # disc(real B)
    disc_fakeA = jax.random.normal(ks[9], (PB, PC, PH, PW), jnp.float32)  # disc(fake A)
    disc_fakeB = jax.random.normal(ks[10], (PB, PC, PH, PW), jnp.float32) # disc(fake B)

    ref = _reference_loss(data, reconstructedA, reconstructedB, idtA, idtB,
                          discA, discB, disc_fakeA, disc_fakeB)

    # 1) tile_rows=8 -> 4 grid steps at these toy sizes: exercises the streaming
    #    init / accumulate / finalize path (production uses the 1024-row default cap).
    loss = cyclegan_loss(data, fakeA, fakeB, reconstructedA, reconstructedB,
                         idtA, idtB, discA, discB, disc_fakeA, disc_fakeB,
                         tile_rows=8)
    loss = jax.block_until_ready(loss)
    assert jnp.allclose(loss, ref, rtol=1e-4, atol=1e-5), (loss, ref)

    # 2) tile_rows=24 over 32 rows -> ragged last tile: exercises the in-kernel row mask
    #    that replaces the old wrapper-side jnp.pad.
    loss_ragged = cyclegan_loss(data, fakeA, fakeB, reconstructedA, reconstructedB,
                                idtA, idtB, discA, discB, disc_fakeA, disc_fakeB,
                                tile_rows=24)
    loss_ragged = jax.block_until_ready(loss_ragged)
    assert jnp.allclose(loss_ragged, ref, rtol=1e-4, atol=1e-5), (loss_ragged, ref)

    print("KERNEL_OK")
</pallas_src>

<mosaic_0001>
module attributes {stable_mosaic.version = 11 : i64} {
  func.func @kernel(%arg0: i32, %arg1: memref<8x128xf32, #tpu.memory_space<vmem>>, %arg2: memref<8x128xf32, #tpu.memory_space<vmem>>, %arg3: memref<8x128xf32, #tpu.memory_space<vmem>>, %arg4: memref<8x128xf32, #tpu.memory_space<vmem>>, %arg5: memref<8x128xf32, #tpu.memory_space<vmem>>, %arg6: memref<8x128xf32, #tpu.memory_space<vmem>>, %arg7: memref<8x128xf32, #tpu.memory_space<vmem>>, %arg8: memref<8x128xf32, #tpu.memory_space<vmem>>, %arg9: memref<8x128xf32, #tpu.memory_space<vmem>>, %arg10: memref<8x128xf32, #tpu.memory_space<vmem>>, %arg11: memref<8x128xf32, #tpu.memory_space<vmem>>, %arg12: memref<2x8x128xf32, #tpu.memory_space<vmem>>) attributes {dimension_semantics = [#tpu.dimension_semantics<arbitrary>], iteration_bounds = array<i64: 4>, scalar_prefetch = 0 : i64, scratch_operands = 1 : i64, tpu.core_type = #tpu.core_type<tc>, window_params = [{transform_indices = @transform_0, window_bounds = array<i64: 8, 128>}, {transform_indices = @transform_1, window_bounds = array<i64: 8, 128>}, {transform_indices = @transform_2, window_bounds = array<i64: 8, 128>}, {transform_indices = @transform_3, window_bounds = array<i64: 8, 128>}, {transform_indices = @transform_4, window_bounds = array<i64: 8, 128>}, {transform_indices = @transform_5, window_bounds = array<i64: 8, 128>}, {pipeline_mode = #tpu.pipeline_mode<synchronous>, transform_indices = @transform_6, window_bounds = array<i64: 8, 128>}, {pipeline_mode = #tpu.pipeline_mode<synchronous>, transform_indices = @transform_7, window_bounds = array<i64: 8, 128>}, {pipeline_mode = #tpu.pipeline_mode<synchronous>, transform_indices = @transform_8, window_bounds = array<i64: 8, 128>}, {pipeline_mode = #tpu.pipeline_mode<synchronous>, transform_indices = @transform_9, window_bounds = array<i64: 8, 128>}, {pipeline_mode = #tpu.pipeline_mode<synchronous>, transform_indices = @transform_10, window_bounds = array<i64: 8, 128>}]} {
    %c0_i32 = arith.constant 0 : i32
    %0 = arith.cmpi eq, %arg0, %c0_i32 : i32
    %1 = arith.extui %0 : i1 to i32
    %c0_i32_0 = arith.constant 0 : i32
    %2 = arith.cmpi ne, %1, %c0_i32_0 : i32
    scf.if %2 {
      %cst = arith.constant 0.000000e+00 : f32
      %34 = vector.broadcast %cst : f32 to vector<2x8x128xf32>
      %c0_24 = arith.constant 0 : index
      %c0_25 = arith.constant 0 : index
      %c0_26 = arith.constant 0 : index
      %35 = vector.load %arg12[%c0_24, %c0_25, %c0_26] : memref<2x8x128xf32, #tpu.memory_space<vmem>>, vector<2x8x128xf32>
      tpu.vector_store %arg12[%c0_24, %c0_25, %c0_26], %34 {strides = array<i32>} : memref<2x8x128xf32, #tpu.memory_space<vmem>>, vector<2x8x128xf32>,
    } else {
    }
    %c0 = arith.constant 0 : index
    %c0_1 = arith.constant 0 : index
    %3 = vector.load %arg1[%c0, %c0_1] : memref<8x128xf32, #tpu.memory_space<vmem>>, vector<8x128xf32>
    %c0_2 = arith.constant 0 : index
    %c0_3 = arith.constant 0 : index
    %4 = vector.load %arg4[%c0_2, %c0_3] : memref<8x128xf32, #tpu.memory_space<vmem>>, vector<8x128xf32>
    %c0_4 = arith.constant 0 : index
    %c0_5 = arith.constant 0 : index
    %c0_6 = arith.constant 0 : index
    %5 = vector.load %arg12[%c0_4, %c0_5, %c0_6] : memref<2x8x128xf32, #tpu.memory_space<vmem>>, vector<1x8x128xf32>
    %6 = vector.shape_cast %5 : vector<1x8x128xf32> to vector<8x128xf32>
    %c0_7 = arith.constant 0 : index
    %c0_8 = arith.constant 0 : index
    %7 = vector.load %arg2[%c0_7, %c0_8] : memref<8x128xf32, #tpu.memory_space<vmem>>, vector<8x128xf32>
    %8 = arith.subf %3, %7 : vector<8x128xf32>
    %9 = arith.mulf %8, %8 : vector<8x128xf32>
    %c0_9 = arith.constant 0 : index
    %c0_10 = arith.constant 0 : index
    %10 = vector.load %arg5[%c0_9, %c0_10] : memref<8x128xf32, #tpu.memory_space<vmem>>, vector<8x128xf32>
    %11 = arith.subf %4, %10 : vector<8x128xf32>
    %12 = arith.mulf %11, %11 : vector<8x128xf32>
    %13 = arith.addf %9, %12 : vector<8x128xf32>
    %14 = arith.addf %6, %13 : vector<8x128xf32>
    %c0_11 = arith.constant 0 : index
    %c0_12 = arith.constant 0 : index
    %c0_13 = arith.constant 0 : index
    %15 = vector.load %arg12[%c0_11, %c0_12, %c0_13] : memref<2x8x128xf32, #tpu.memory_space<vmem>>, vector<1x8x128xf32>
    %16 = vector.shape_cast %15 : vector<1x8x128xf32> to vector<8x128xf32>
    %17 = vector.shape_cast %14 : vector<8x128xf32> to vector<1x8x128xf32>
    tpu.vector_store %arg12[%c0_11, %c0_12, %c0_13], %17 {strides = array<i32>} : memref<2x8x128xf32, #tpu.memory_space<vmem>>, vector<1x8x128xf32>,
    %c1 = arith.constant 1 : index
    %c0_14 = arith.constant 0 : index
    %c0_15 = arith.constant 0 : index
    %18 = vector.load %arg12[%c1, %c0_14, %c0_15] : memref<2x8x128xf32, #tpu.memory_space<vmem>>, vector<1x8x128xf32>
    %19 = vector.shape_cast %18 : vector<1x8x128xf32> to vector<8x128xf32>
    %c0_16 = arith.constant 0 : index
    %c0_17 = arith.constant 0 : index
    %20 = vector.load %arg3[%c0_16, %c0_17] : memref<8x128xf32, #tpu.memory_space<vmem>>, vector<8x128xf32>
    %21 = arith.subf %3, %20 : vector<8x128xf32>
    %22 = arith.mulf %21, %21 : vector<8x128xf32>
    %c0_18 = arith.constant 0 : index
    %c0_19 = arith.constant 0 : index
    %23 = vector.load %arg6[%c0_18, %c0_19] : memref<8x128xf32, #tpu.memory_space<vmem>>, vector<8x128xf32>
    %24 = arith.subf %4, %23 : vector<8x128xf32>
    %25 = arith.mulf %24, %24 : vector<8x128xf32>
    %26 = arith.addf %22, %25 : vector<8x128xf32>
    %27 = arith.addf %19, %26 : vector<8x128xf32>
    %c1_20 = arith.constant 1 : index
    %c0_21 = arith.constant 0 : index
    %c0_22 = arith.constant 0 : index
    %28 = vector.load %arg12[%c1_20, %c0_21, %c0_22] : memref<2x8x128xf32, #tpu.memory_space<vmem>>, vector<1x8x128xf32>
    %29 = vector.shape_cast %28 : vector<1x8x128xf32> to vector<8x128xf32>
    %30 = vector.shape_cast %27 : vector<8x128xf32> to vector<1x8x128xf32>
    tpu.vector_store %arg12[%c1_20, %c0_21, %c0_22], %30 {strides = array<i32>} : memref<2x8x128xf32, #tpu.memory_space<vmem>>, vector<1x8x128xf32>,
    %c3_i32 = arith.constant 3 : i32
    %31 = arith.cmpi eq, %arg0, %c3_i32 : i32
    %32 = arith.extui %31 : i1 to i32
    %c0_i32_23 = arith.constant 0 : i32
    %33 = arith.cmpi ne, %32, %c0_i32_23 : i32
    scf.if %33 {
      %c0_24 = arith.constant 0 : index
      %c0_25 = arith.constant 0 : index
      %c0_26 = arith.constant 0 : index
      %34 = vector.load %arg12[%c0_24, %c0_25, %c0_26] : memref<2x8x128xf32, #tpu.memory_space<vmem>>, vector<1x8x128xf32>
      %35 = vector.shape_cast %34 : vector<1x8x128xf32> to vector<8x128xf32>
      %36 = vector.shape_cast %35 : vector<8x128xf32> to vector<1x8x128xf32>
      %cst = arith.constant dense<0.000000e+00> : vector<1xf32>
      %37 = vector.multi_reduction <add>, %36, %cst [1, 2] : vector<1x8x128xf32> to vector<1xf32>
      %38 = vector.shape_cast %37 : vector<1xf32> to vector<1x1x1xf32>
      %39 = vector.extract %38[0, 0, 0] : f32 from vector<1x1x1xf32>
      %cst_27 = arith.constant 1.000000e-01 : f32
      %40 = arith.mulf %cst_27, %39 : f32
      %c1_28 = arith.constant 1 : index
      %c0_29 = arith.constant 0 : index
      %c0_30 = arith.constant 0 : index
      %41 = vector.load %arg12[%c1_28, %c0_29, %c0_30] : memref<2x8x128xf32, #tpu.memory_space<vmem>>, vector<1x8x128xf32>
      %42 = vector.shape_cast %41 : vector<1x8x128xf32> to vector<8x128xf32>
      %43 = vector.shape_cast %42 : vector<8x128xf32> to vector<1x8x128xf32>
      %cst_31 = arith.constant dense<0.000000e+00> : vector<1xf32>
      %44 = vector.multi_reduction <add>, %43, %cst_31 [1, 2] : vector<1x8x128xf32> to vector<1xf32>
      %45 = vector.shape_cast %44 : vector<1xf32> to vector<1x1x1xf32>
      %46 = vector.extract %45[0, 0, 0] : f32 from vector<1x1x1xf32>
      %cst_32 = arith.constant 1.000000e-03 : f32
      %47 = arith.mulf %cst_32, %46 : f32
      %48 = arith.addf %40, %47 : f32
      %cst_33 = arith.constant 2.44140625E-4 : f32
      %49 = arith.mulf %48, %cst_33 : f32
      %50 = tpu.iota {dimensions = array<i32: 0>} : vector<8x128xi32>
      %51 = tpu.iota {dimensions = array<i32: 1>} : vector<8x128xi32>
      %c128_i32 = arith.constant 128 : i32
      %52 = vector.broadcast %c128_i32 : i32 to vector<8x128xi32>
      %53 = arith.muli %50, %52 : vector<8x128xi32>
      %54 = arith.addi %53, %51 : vector<8x128xi32>
      %c126_i32 = arith.constant 126 : i32
      %55 = vector.broadcast %c126_i32 : i32 to vector<8x128xi32>
      %56 = arith.cmpi slt, %54, %55 : vector<8x128xi32>
      %c0_34 = arith.constant 0 : index
      %c0_35 = arith.constant 0 : index
      %57 = vector.load %arg7[%c0_34, %c0_35] : memref<8x128xf32, #tpu.memory_space<vmem>>, vector<8x128xf32>
      %c0_36 = arith.constant 0 : index
      %c0_37 = arith.constant 0 : index
      %58 = vector.load %arg8[%c0_36, %c0_37] : memref<8x128xf32, #tpu.memory_space<vmem>>, vector<8x128xf32>
      %c0_38 = arith.constant 0 : index
      %c0_39 = arith.constant 0 : index
      %59 = vector.load %arg9[%c0_38, %c0_39] : memref<8x128xf32, #tpu.memory_space<vmem>>, vector<8x128xf32>
      %c0_40 = arith.constant 0 : index
      %c0_41 = arith.constant 0 : index
      %60 = vector.load %arg10[%c0_40, %c0_41] : memref<8x128xf32, #tpu.memory_space<vmem>>, vector<8x128xf32>
      %cst_42 = arith.constant 1.000000e+00 : f32
      %61 = vector.broadcast %cst_42 : f32 to vector<8x128xf32>
      %62 = arith.subf %57, %61 : vector<8x128xf32>
      %63 = math.absf %62 : vector<8x128xf32>
      %cst_43 = arith.constant 0.000000e+00 : f32
      %64 = vector.broadcast %cst_43 : f32 to vector<8x128xf32>
      %65 = arith.select %56, %63, %64 : vector<8x128xi1>, vector<8x128xf32>
      %66 = vector.shape_cast %65 : vector<8x128xf32> to vector<1x8x128xf32>
      %cst_44 = arith.constant dense<0.000000e+00> : vector<1xf32>
      %67 = vector.multi_reduction <add>, %66, %cst_44 [1, 2] : vector<1x8x128xf32> to vector<1xf32>
      %68 = vector.shape_cast %67 : vector<1xf32> to vector<1x1x1xf32>
      %69 = vector.extract %68[0, 0, 0] : f32 from vector<1x1x1xf32>
      %cst_45 = arith.constant 1.000000e+00 : f32
      %70 = vector.broadcast %cst_45 : f32 to vector<8x128xf32>
      %71 = arith.subf %58, %70 : vector<8x128xf32>
      %72 = math.absf %71 : vector<8x128xf32>
      %cst_46 = arith.constant 0.000000e+00 : f32
      %73 = vector.broadcast %cst_46 : f32 to vector<8x128xf32>
      %74 = arith.select %56, %72, %73 : vector<8x128xi1>, vector<8x128xf32>
      %75 = vector.shape_cast %74 : vector<8x128xf32> to vector<1x8x128xf32>
      %cst_47 = arith.constant dense<0.000000e+00> : vector<1xf32>
      %76 = vector.multi_reduction <add>, %75, %cst_47 [1, 2] : vector<1x8x128xf32> to vector<1xf32>
      %77 = vector.shape_cast %76 : vector<1xf32> to vector<1x1x1xf32>
      %78 = vector.extract %77[0, 0, 0] : f32 from vector<1x1x1xf32>
      %79 = arith.addf %69, %78 : f32
      %cst_48 = arith.constant 1.000000e+00 : f32
      %80 = vector.broadcast %cst_48 : f32 to vector<8x128xf32>
      %81 = arith.subf %59, %80 : vector<8x128xf32>
      %82 = math.absf %81 : vector<8x128xf32>
      %cst_49 = arith.constant 0.000000e+00 : f32
      %83 = vector.broadcast %cst_49 : f32 to vector<8x128xf32>
      %84 = arith.select %56, %82, %83 : vector<8x128xi1>, vector<8x128xf32>
      %85 = vector.shape_cast %84 : vector<8x128xf32> to vector<1x8x128xf32>
      %cst_50 = arith.constant dense<0.000000e+00> : vector<1xf32>
      %86 = vector.multi_reduction <add>, %85, %cst_50 [1, 2] : vector<1x8x128xf32> to vector<1xf32>
      %87 = vector.shape_cast %86 : vector<1xf32> to vector<1x1x1xf32>
      %88 = vector.extract %87[0, 0, 0] : f32 from vector<1x1x1xf32>
      %89 = math.absf %57 : vector<8x128xf32>
      %cst_51 = arith.constant 0.000000e+00 : f32
      %90 = vector.broadcast %cst_51 : f32 to vector<8x128xf32>
      %91 = arith.select %56, %89, %90 : vector<8x128xi1>, vector<8x128xf32>
      %92 = vector.shape_cast %91 : vector<8x128xf32> to vector<1x8x128xf32>
      %cst_52 = arith.constant dense<0.000000e+00> : vector<1xf32>
      %93 = vector.multi_reduction <add>, %92, %cst_52 [1, 2] : vector<1x8x128xf32> to vector<1xf32>
      %94 = vector.shape_cast %93 : vector<1xf32> to vector<1x1x1xf32>
      %95 = vector.extract %94[0, 0, 0] : f32 from vector<1x1x1xf32>
      %96 = arith.addf %88, %95 : f32
      %cst_53 = arith.constant 5.000000e-01 : f32
      %97 = arith.mulf %cst_53, %96 : f32
      %98 = arith.addf %79, %97 : f32
      %cst_54 = arith.constant 1.000000e+00 : f32
      %99 = vector.broadcast %cst_54 : f32 to vector<8x128xf32>
      %100 = arith.subf %60, %99 : vector<8x128xf32>
      %101 = math.absf %100 : vector<8x128xf32>
      %cst_55 = arith.constant 0.000000e+00 : f32
      %102 = vector.broadcast %cst_55 : f32 to vector<8x128xf32>
      %103 = arith.select %56, %101, %102 : vector<8x128xi1>, vector<8x128xf32>
      %104 = vector.shape_cast %103 : vector<8x128xf32> to vector<1x8x128xf32>
      %cst_56 = arith.constant dense<0.000000e+00> : vector<1xf32>
      %105 = vector.multi_reduction <add>, %104, %cst_56 [1, 2] : vector<1x8x128xf32> to vector<1xf32>
      %106 = vector.shape_cast %105 : vector<1xf32> to vector<1x1x1xf32>
      %107 = vector.extract %106[0, 0, 0] : f32 from vector<1x1x1xf32>
      %108 = math.absf %58 : vector<8x128xf32>
      %cst_57 = arith.constant 0.000000e+00 : f32
      %109 = vector.broadcast %cst_57 : f32 to vector<8x128xf32>
      %110 = arith.select %56, %108, %109 : vector<8x128xi1>, vector<8x128xf32>
      %111 = vector.shape_cast %110 : vector<8x128xf32> to vector<1x8x128xf32>
      %cst_58 = arith.constant dense<0.000000e+00> : vector<1xf32>
      %112 = vector.multi_reduction <add>, %111, %cst_58 [1, 2] : vector<1x8x128xf32> to vector<1xf32>
      %113 = vector.shape_cast %112 : vector<1xf32> to vector<1x1x1xf32>
      %114 = vector.extract %113[0, 0, 0] : f32 from vector<1x1x1xf32>
      %115 = arith.addf %107, %114 : f32
      %cst_59 = arith.constant 5.000000e-01 : f32
      %116 = arith.mulf %cst_59, %115 : f32
      %117 = arith.addf %98, %116 : f32
      %cst_60 = arith.constant 0.00793650839 : f32
      %118 = arith.mulf %117, %cst_60 : f32
      %119 = arith.addf %49, %118 : f32
      %120 = vector.broadcast %119 : f32 to vector<8x128xf32>
      %c0_61 = arith.constant 0 : index
      %c0_62 = arith.constant 0 : index
      %121 = vector.load %arg11[%c0_61, %c0_62] : memref<8x128xf32, #tpu.memory_space<vmem>>, vector<8x128xf32>
      tpu.vector_store %arg11[%c0_61, %c0_62], %120 {strides = array<i32>} : memref<8x128xf32, #tpu.memory_space<vmem>>, vector<8x128xf32>,
    } else {
    }
    return
  }
  func.func @transform_0(%arg0: i32) -> (i32, i32) {
    %c0_i32 = arith.constant 0 : i32
    %c0_i32_0 = arith.constant 0 : i32
    return %arg0, %c0_i32 : i32, i32
  }
  func.func @transform_1(%arg0: i32) -> (i32, i32) {
    %c0_i32 = arith.constant 0 : i32
    %c0_i32_0 = arith.constant 0 : i32
    return %arg0, %c0_i32 : i32, i32
  }
  func.func @transform_2(%arg0: i32) -> (i32, i32) {
    %c0_i32 = arith.constant 0 : i32
    %c0_i32_0 = arith.constant 0 : i32
    return %arg0, %c0_i32 : i32, i32
  }
  func.func @transform_3(%arg0: i32) -> (i32, i32) {
    %c0_i32 = arith.constant 0 : i32
    %c0_i32_0 = arith.constant 0 : i32
    return %arg0, %c0_i32 : i32, i32
  }
  func.func @transform_4(%arg0: i32) -> (i32, i32) {
    %c0_i32 = arith.constant 0 : i32
    %c0_i32_0 = arith.constant 0 : i32
    return %arg0, %c0_i32 : i32, i32
  }
  func.func @transform_5(%arg0: i32) -> (i32, i32) {
    %c0_i32 = arith.constant 0 : i32
    %c0_i32_0 = arith.constant 0 : i32
    return %arg0, %c0_i32 : i32, i32
  }
  func.func @transform_6(%arg0: i32) -> (i32, i32) {
    %c0_i32 = arith.constant 0 : i32
    %c0_i32_0 = arith.constant 0 : i32
    %c0_i32_1 = arith.constant 0 : i32
    return %c0_i32, %c0_i32_0 : i32, i32
  }
  func.func @transform_7(%arg0: i32) -> (i32, i32) {
    %c0_i32 = arith.constant 0 : i32
    %c0_i32_0 = arith.constant 0 : i32
    %c0_i32_1 = arith.constant 0 : i32
    return %c0_i32, %c0_i32_0 : i32, i32
  }
  func.func @transform_8(%arg0: i32) -> (i32, i32) {
    %c0_i32 = arith.constant 0 : i32
    %c0_i32_0 = arith.constant 0 : i32
    %c0_i32_1 = arith.constant 0 : i32
    return %c0_i32, %c0_i32_0 : i32, i32
  }
  func.func @transform_9(%arg0: i32) -> (i32, i32) {
    %c0_i32 = arith.constant 0 : i32
    %c0_i32_0 = arith.constant 0 : i32
    %c0_i32_1 = arith.constant 0 : i32
    return %c0_i32, %c0_i32_0 : i32, i32
  }
  func.func @transform_10(%arg0: i32) -> (i32, i32) {
    %c0_i32 = arith.constant 0 : i32
    %c0_i32_0 = arith.constant 0 : i32
    %c0_i32_1 = arith.constant 0 : i32
    return %c0_i32, %c0_i32_0 : i32, i32
  }
}

</mosaic_0001>

<bundles_post_ra>
// kernel: tpu_custom_call.1
= control target key start
LH: loop header
LB: loop body
LE: loop exit
PB: predicated region body
PF: predicated region fallthrough
CT: control target
= control target key end

     0   :  { %s1610_s0 = inlined_call_operand.hbm [shape: f32[32,128], index: 0, kind: input, shape index: {}]   ;;  %s1611_s1 = inlined_call_operand.hbm [shape: f32[32,128], index: 1, kind: input, shape index: {}]   ;;  %s1612_s2 = inlined_call_operand.hbm [shape: f32[32,128], index: 2, kind: input, shape index: {}]   ;;  %s1613_s3 = inlined_call_operand.hbm [shape: f32[32,128], index: 3, kind: input, shape index: {}]   ;;  %s1614_s4 = inlined_call_operand.hbm [shape: f32[32,128], index: 4, kind: input, shape index: {}]   ;;  %s1615_s5 = inlined_call_operand.hbm [shape: f32[32,128], index: 5, kind: input, shape index: {}]   ;;  %s1616_s6 = inlined_call_operand.vmem [shape: f32[8,128], index: 6, kind: input, shape index: {}]   ;;  %s1617_s7 = inlined_call_operand.vmem [shape: f32[8,128], index: 7, kind: input, shape index: {}]   ;;  %s1618_s8 = inlined_call_operand.vmem [shape: f32[8,128], index: 8, kind: input, shape index: {}]   ;;  %s1619_s9 = inlined_call_operand.vmem [shape: f32[8,128], index: 9, kind: input, shape index: {}]   ;;  %s1620_s10 = inlined_call_operand.hbm [shape: f32[8,128], index: 10, kind: output, shape index: {}]  }
   0x1   :  { %1629 = sst [smem:[#allocation23_spill]] %s1611_s1 }
   0x2   :  { %1630 = sst [smem:[#allocation24_spill]] %s1613_s3 }
   0x3   :  { %1631 = sst [smem:[#allocation25_spill]] %s1620_s10 }
   0x4   :  { %15 = vsyncpa [#allocation4], 0 }
   0x5   :  { %17 = vsyncpa [#allocation4 + $0x1], 0 }
   0x6   :  { %18 = vsyncpa [#allocation7], 0 }
   0x7   :  { %20 = vsyncpa [#allocation7 + $0x1], 0 }
   0x8   :  { %21 = vsyncpa [#allocation10], 0 }
   0x9   :  { %23 = vsyncpa [#allocation10 + $0x1], 0 }
   0xa   :  { %24 = vsyncpa [#allocation13], 0 }
   0xb   :  { %26 = vsyncpa [#allocation13 + $0x1], 0 }
   0xc   :  { %27 = vsyncpa [#allocation5], 0  ;;  %s1298_s13 = smov 0   ;;  %s1300_s14 = smov 0  }
   0xd   :  { %s1302_s15 = smov 0   ;;  %s1304_s16 = smov 0  }
   0xe LB: > { %1632 = sst [smem:[#allocation20_spill]] %s1229_s15  ;;  %s1317_s17 = sadd.s32 4294967295, %s1233_s16   ;;  %s1233_s16 = sphi %s1304_s16, %s1653_s16   ;;  %s1229_s15 = sphi %s1302_s15, %s1655_s15   ;;  %s1225_s14 = sphi %s1300_s14, %s1657_s14   ;;  %s1221_s13 = sphi %s1298_s13, %s1656_s13  }
   0xf   : > { %s1320_s18 = sadd.s32 1, %s1233_s16   ;;  %s40_s20 = sadd.s32 1, %s1229_s15 }
  0x10   : > { %1633 = sst [smem:[#allocation21_spill]] %s1320_s18  ;;  %s37_s19 = ssub.s32 %s1233_s16, %s1320_s18 }
  0x11   : > { %p38_p0 = scmp.eq.s32.totalorder %s37_s19, 0  ;;  %p47_p1 = scmp.ne.s32.totalorder %s1229_s15, %s1225_s14 }
  0x12   : > { %p48_p2 = scmp.eq.s32.totalorder %s1233_s16, 0  ;;  %p53_p3 = scmp.ne.s32.totalorder %s1225_s14, %s1221_s13 }
  0x13   : > { %s1330_s21 = scalar_select %p38_p0, %s1229_s15, %s40_s20  }
  0x14   : > { %p49_p4 = por %p48_p2, %p47_p1  ;;  %p54_p5 = scmp.eq.s32.totalorder %s1317_s17, 0 }
  0x15   : > { %1634 = sst [smem:[#allocation22_spill]] %s1330_s21  ;;  %p940_p6 = scmp.lt.s32.totalorder %s1233_s16, 4 }
  0x16   : > { %p1334_p7 = por %p54_p5, %p53_p3  ;;  %s1339_s23 = sand.u32 1, %s1229_s15  }
  0x17   : > { %s1342_s24 = sshll.u32 %s1339_s23, 3  ;;  %s1345_s25 = sshll.u32 %s1233_s16, 7 }
  0x18   : > { %s1635_s22 = scalar_select %p1334_p7, 1, 0 }
  0x19   : > { %p1347_p8 = pnand %p940_p6, %p49_p4  ;;  %s1622_s27 = sand.u32 1, %s1233_s16  }
  0x1a   : > { %s1637_s1 = sld [smem:[#allocation23_spill]]  ;;  %s346_s11 = scalar_lea.vmem [#allocation6], %s1342_s24 }
  0x1b   : > { %s1636_s26 = scalar_select %p1347_p8, 1, 0 }
  0x1c   : > { %s353_s12 = sshll.u32 %s346_s11, 4  ;;  %s1365_s13 = scalar_lea.sflag [#allocation7], %s1622_s27  ;;  %s1360_s12 = int_to_ptr.vmem [resolvable:$true] %s353_s12 }
  0x1d   : > { %p1371_p12 = pneg %p1347_p8 }
  0x20   : > { %s1356_s30 = scalar_lea.hbm %s1637_s1, %s1345_s25  ;;  %s982_s11 = scalar_lea.hbm %s1637_s1, 512 }
  0x21   : > { %s977_s19 = scalar_lea.hbm %s1356_s30, 128  ;;  %p983_p1 = scmp.lt.u32.totalorder %s1356_s30, %s1637_s1 }
  0x22   : > { %p978_p11 = scmp.ne.s32.totalorder %s1356_s30, %s977_s19  ;;  %p984_p2 = scmp.lt.u32.totalorder %s982_s11, %s977_s19 }
  0x23   : > { %p986_p4 = scmp.lt.u32.totalorder %s977_s19, %s1356_s30 }
  0x24   : > { %p980_p13 = pnand %p1371_p12, %p978_p11  ;;  %p985_p3 = por %p984_p2, %p983_p1 }
  0x26   : > { %p981_p0 = pneg %p980_p13  ;;  %p987_p5 = por %p986_p4, %p985_p3 }
  0x28   : > { %p988_p6 = pnand %p987_p5, %p981_p0 }
  0x2a   : > { %991 = shalt.err (!%p988_p6)
}
  0x2b   : > { %s992_s27 = scalar_lea.vmem %s1360_s12, 128  ;;  %s1235_s28 = smov [#allocation6]  }
  0x2c   : > { %p993_p11 = scmp.ne.s32.totalorder %s1360_s12, %s992_s27  ;;  %s997_s29 = sshll.u32 %s1235_s28, 4  ;;  %s998_s29 = int_to_ptr.vmem [resolvable:$false] %s997_s29 }
  0x2d   : > { %s999_s15 = scalar_lea.vmem %s998_s29, 256  ;;  %p1000_p10 = scmp.lt.s32.totalorder %s1360_s12, %s998_s29 }
  0x2e   : > { %p995_p13 = pnand %p993_p11, %p1371_p12  ;;  %p1001_p7 = scmp.lt.s32.totalorder %s999_s15, %s992_s27 }
  0x30   : > { %p996_p9 = pneg %p995_p13  ;;  %p1002_p1 = por %p1001_p7, %p1000_p10 }
  0x32   : > { %p1003_p2 = pnand %p1002_p1, %p996_p9 }
  0x34   : > { %1006 = shalt.err (!%p1003_p2)
}
  0x35   : > { %927 = dma.hbm_to_vmem [thread:$0]  (!%p1347_p8), %s1356_s30, 128, %s1360_s12, %s1365_s13  }
  0x36   : > { %p1639_p0 = scmp.lt.s32.totalorder %s1233_s16, 5  ;;  %p1640_p3 = scmp.ge.s32.totalorder %s1233_s16, 1 }
  0x37   : > { %s1642_s3 = sld [smem:[#allocation24_spill]]  ;;  %s382_s28 = scalar_lea.vmem [#allocation9], %s1342_s24 }
  0x38   : > { %p1399_p4 = pnand %p1640_p3, %p1639_p0  ;;  %s389_s29 = sshll.u32 %s382_s28, 4  ;;  %s390_s29 = int_to_ptr.vmem [resolvable:$true] %s389_s29 }
  0x39   : > { %s1643_s15 = sand.u32 1, %s1233_s16  }
  0x3a   : > { %s1641_s21 = scalar_select %p1399_p4, 1, 0 }
  0x3b   : > { %s1412_s30 = scalar_lea.sflag [#allocation10], %s1643_s15 }
  0x3d   : > { %s1407_s11 = scalar_lea.hbm %s1642_s3, %s1345_s25  ;;  %s1012_s27 = scalar_lea.hbm %s1642_s3, 512 }
  0x3e   : > { %s1007_s12 = scalar_lea.hbm %s1407_s11, 128  ;;  %p1013_p5 = scmp.lt.u32.totalorder %s1407_s11, %s1642_s3 }
  0x3f   : > { %p1008_p7 = scmp.ne.s32.totalorder %s1407_s11, %s1007_s12  ;;  %p1014_p6 = scmp.lt.u32.totalorder %s1012_s27, %s1007_s12 }
  0x40   : > { %p1016_p13 = scmp.lt.u32.totalorder %s1007_s12, %s1407_s11 }
  0x41   : > { %p1010_p9 = pnand %p1008_p7, %p1371_p12  ;;  %p1015_p11 = por %p1014_p6, %p1013_p5 }
  0x43   : > { %p1011_p10 = pneg %p1010_p9  ;;  %p1017_p1 = por %p1016_p13, %p1015_p11 }
  0x45   : > { %p1018_p2 = pnand %p1017_p1, %p1011_p10 }
  0x47   : > { %1021 = shalt.err (!%p1018_p2)
}
  0x48   : > { %s1022_s16 = scalar_lea.vmem %s390_s29, 128  ;;  %s1236_s28 = smov [#allocation9]  }
  0x49   : > { %p1023_p0 = scmp.ne.s32.totalorder %s390_s29, %s1022_s16  ;;  %s1027_s15 = sshll.u32 %s1236_s28, 4  ;;  %s1028_s15 = int_to_ptr.vmem [resolvable:$false] %s1027_s15 }
  0x4a   : > { %s1029_s1 = scalar_lea.vmem %s1028_s15, 256  ;;  %p1030_p9 = scmp.lt.s32.totalorder %s390_s29, %s1028_s15 }
  0x4b   : > { %p1025_p3 = pnand %p1023_p0, %p1371_p12  ;;  %p1031_p4 = scmp.lt.s32.totalorder %s1029_s1, %s1022_s16 }
  0x4d   : > { %p1026_p7 = pneg %p1025_p3  ;;  %p1032_p8 = por %p1031_p4, %p1030_p9 }
  0x4f   : > { %p1033_p5 = pnand %p1032_p8, %p1026_p7 }
  0x51   : > { %1036 = shalt.err (!%p1033_p5)
}
  0x52   : > { %p1644_p6 = scmp.ne.s32.totalorder %s1636_s26, 0  ;;  %s1436_s12 = scalar_lea.hbm %s1610_s0, %s1345_s25 }
  0x53   : > { %s328_s27 = scalar_lea.vmem [#allocation3], %s1342_s24  ;;  %s325_s16 = scalar_lea.sflag [#allocation4], %s1339_s23 }
  0x54   : > { %933 = dma.hbm_to_vmem [thread:$0]  (!%p1644_p6), %s1407_s11, 128, %s390_s29, %s1412_s30  }
  0x55   : > { %s335_s19 = sshll.u32 %s328_s27, 4  ;;  %s1037_s28 = scalar_lea.hbm %s1436_s12, 128  ;;  %s336_s19 = int_to_ptr.vmem [resolvable:$true] %s335_s19 }
  0x56   : > { %p1038_p8 = scmp.ne.s32.totalorder %s1436_s12, %s1037_s28  ;;  %s1042_s29 = scalar_lea.hbm %s1610_s0, 512 }
  0x57   : > { %p1043_p11 = scmp.lt.u32.totalorder %s1436_s12, %s1610_s0  ;;  %p1044_p13 = scmp.lt.u32.totalorder %s1042_s29, %s1037_s28 }
  0x58   : > { %p1040_p4 = pnand %p1038_p8, %p1371_p12  ;;  %p1046_p2 = scmp.lt.u32.totalorder %s1037_s28, %s1436_s12 }
  0x59   : > { %p1045_p1 = por %p1044_p13, %p1043_p11 }
  0x5a   : > { %p1041_p10 = pneg %p1040_p4 }
  0x5b   : > { %p1047_p0 = por %p1046_p2, %p1045_p1 }
  0x5d   : > { %p1048_p3 = pnand %p1047_p0, %p1041_p10 }
  0x5f   : > { %1051 = shalt.err (!%p1048_p3)
}
  0x60   : > { %s1052_s18 = scalar_lea.vmem %s336_s19, 128  ;;  %s1237_s27 = smov [#allocation3]  }
  0x61   : > { %p1053_p7 = scmp.ne.s32.totalorder %s336_s19, %s1052_s18  ;;  %s1057_s3 = sshll.u32 %s1237_s27, 4  ;;  %s1058_s3 = int_to_ptr.vmem [resolvable:$false] %s1057_s3 }
  0x62   : > { %s1059_s15 = scalar_lea.vmem %s1058_s3, 256  ;;  %p1060_p8 = scmp.lt.s32.totalorder %s336_s19, %s1058_s3 }
  0x63   : > { %p1055_p9 = pnand %p1053_p7, %p1371_p12  ;;  %p1061_p4 = scmp.lt.s32.totalorder %s1059_s15, %s1052_s18 }
  0x65   : > { %p1056_p5 = pneg %p1055_p9  ;;  %p1062_p6 = por %p1061_p4, %p1060_p8 }
  0x67   : > { %p1063_p11 = pnand %p1062_p6, %p1056_p5 }
  0x69   : > { %1066 = shalt.err (!%p1063_p11)
}
  0x6a   : > { %p1645_p13 = scmp.ne.s32.totalorder %s1636_s26, 0  ;;  %s1461_s29 = scalar_lea.hbm %s1612_s2, %s1345_s25 }
  0x6b   : > { %s364_s3 = scalar_lea.vmem [#allocation8], %s1342_s24  ;;  %s1067_s10 = scalar_lea.hbm %s1461_s29, 128 }
  0x6c   : > { %924 = dma.hbm_to_vmem [thread:$0]  (!%p1645_p13), %s1436_s12, 128, %s336_s19, %s325_s16  }
  0x6d   : > { %s371_s1 = sshll.u32 %s364_s3, 4  ;;  %p1068_p6 = scmp.ne.s32.totalorder %s1461_s29, %s1067_s10  ;;  %s372_s1 = int_to_ptr.vmem [resolvable:$true] %s371_s1 }
  0x6e   : > { %s1072_s12 = scalar_lea.hbm %s1612_s2, 512  ;;  %p1073_p2 = scmp.lt.u32.totalorder %s1461_s29, %s1612_s2 }
  0x6f   : > { %p1070_p10 = pnand %p1068_p6, %p1371_p12  ;;  %p1074_p0 = scmp.lt.u32.totalorder %s1072_s12, %s1067_s10 }
  0x70   : > { %p1076_p7 = scmp.lt.u32.totalorder %s1067_s10, %s1461_s29 }
  0x71   : > { %p1071_p1 = pneg %p1070_p10  ;;  %p1075_p3 = por %p1074_p0, %p1073_p2 }
  0x73   : > { %p1077_p9 = por %p1076_p7, %p1075_p3 }
  0x75   : > { %p1078_p5 = pnand %p1077_p9, %p1071_p1 }
  0x77   : > { %1081 = shalt.err (!%p1078_p5)
}
  0x78   : > { %s1082_s15 = scalar_lea.vmem %s372_s1, 128  ;;  %s1238_s28 = smov [#allocation8]  }
  0x79   : > { %p1083_p8 = scmp.ne.s32.totalorder %s372_s1, %s1082_s15  ;;  %s1087_s11 = sshll.u32 %s1238_s28, 4  ;;  %s1088_s11 = int_to_ptr.vmem [resolvable:$false] %s1087_s11 }
  0x7a   : > { %s1089_s3 = scalar_lea.vmem %s1088_s11, 256  ;;  %p1090_p6 = scmp.lt.s32.totalorder %s372_s1, %s1088_s11 }
  0x7b   : > { %p1085_p4 = pnand %p1083_p8, %p1371_p12  ;;  %p1091_p10 = scmp.lt.s32.totalorder %s1089_s3, %s1082_s15 }
  0x7d   : > { %p1086_p11 = pneg %p1085_p4  ;;  %p1092_p13 = por %p1091_p10, %p1090_p6 }
  0x7f   : > { %p1093_p0 = pnand %p1092_p13, %p1086_p11 }
  0x81   : > { %1096 = shalt.err (!%p1093_p0)
}
  0x82   : > { %p1646_p2 = scmp.ne.s32.totalorder %s1636_s26, 0  ;;  %s1486_s27 = scalar_lea.hbm %s1614_s4, %s1345_s25 }
  0x83   : > { %s400_s12 = scalar_lea.vmem [#allocation11], %s1342_s24  ;;  %s1097_s16 = scalar_lea.hbm %s1486_s27, 128 }
  0x84   : > { %930 = dma.hbm_to_vmem [thread:$0]  (!%p1646_p2), %s1461_s29, 128, %s372_s1, %s1365_s13  }
  0x85   : > { %s407_s19 = sshll.u32 %s400_s12, 4  ;;  %p1098_p13 = scmp.ne.s32.totalorder %s1486_s27, %s1097_s16  ;;  %s408_s19 = int_to_ptr.vmem [resolvable:$true] %s407_s19 }
  0x86   : > { %s1102_s13 = scalar_lea.hbm %s1614_s4, 512  ;;  %p1103_p7 = scmp.lt.u32.totalorder %s1486_s27, %s1614_s4 }
  0x87   : > { %p1100_p1 = pnand %p1098_p13, %p1371_p12  ;;  %p1104_p9 = scmp.lt.u32.totalorder %s1102_s13, %s1097_s16 }
  0x88   : > { %p1106_p8 = scmp.lt.u32.totalorder %s1097_s16, %s1486_s27 }
  0x89   : > { %p1101_p3 = pneg %p1100_p1  ;;  %p1105_p5 = por %p1104_p9, %p1103_p7 }
  0x8b   : > { %p1107_p4 = por %p1106_p8, %p1105_p5 }
  0x8d   : > { %p1108_p11 = pnand %p1107_p4, %p1101_p3 }
  0x8f   : > { %1111 = shalt.err (!%p1108_p11)
}
  0x90   : > { %s1112_s11 = scalar_lea.vmem %s408_s19, 128  ;;  %s1239_s3 = smov [#allocation11]  }
  0x91   : > { %p1113_p6 = scmp.ne.s32.totalorder %s408_s19, %s1112_s11  ;;  %s1117_s10 = sshll.u32 %s1239_s3, 4  ;;  %s1118_s10 = int_to_ptr.vmem [resolvable:$false] %s1117_s10 }
  0x92   : > { %s1119_s18 = scalar_lea.vmem %s1118_s10, 256  ;;  %p1120_p13 = scmp.lt.s32.totalorder %s408_s19, %s1118_s10 }
  0x93   : > { %p1115_p10 = pnand %p1113_p6, %p1371_p12  ;;  %p1121_p1 = scmp.lt.s32.totalorder %s1119_s18, %s1112_s11 }
  0x95   : > { %p1116_p0 = pneg %p1115_p10  ;;  %p1122_p2 = por %p1121_p1, %p1120_p13 }
  0x97   : > { %p1123_p7 = pnand %p1122_p2, %p1116_p0 }
  0x99   : > { %1126 = shalt.err (!%p1123_p7)
}
  0x9a   : > { %p1647_p9 = scmp.ne.s32.totalorder %s1636_s26, 0  ;;  %s1511_s15 = scalar_lea.hbm %s1615_s5, %s1345_s25 }
  0x9b   : > { %s418_s28 = scalar_lea.vmem [#allocation12], %s1342_s24  ;;  %s415_s29 = scalar_lea.sflag [#allocation13], %s1339_s23 }
  0x9c   : > { %936 = dma.hbm_to_vmem [thread:$0]  (!%p1647_p9), %s1486_s27, 128, %s408_s19, %s1412_s30  }
  0x9d   : > { %s425_s13 = sshll.u32 %s418_s28, 4  ;;  %s1127_s1 = scalar_lea.hbm %s1511_s15, 128  ;;  %s426_s13 = int_to_ptr.vmem [resolvable:$true] %s425_s13 }
  0x9e   : > { %p1128_p2 = scmp.ne.s32.totalorder %s1511_s15, %s1127_s1  ;;  %s1132_s27 = scalar_lea.hbm %s1615_s5, 512 }
  0x9f   : > { %p1133_p8 = scmp.lt.u32.totalorder %s1511_s15, %s1615_s5  ;;  %p1134_p4 = scmp.lt.u32.totalorder %s1132_s27, %s1127_s1 }
  0xa0   : > { %p1130_p3 = pnand %p1128_p2, %p1371_p12  ;;  %p1136_p6 = scmp.lt.u32.totalorder %s1127_s1, %s1511_s15 }
  0xa1   : > { %p1135_p11 = por %p1134_p4, %p1133_p8 }
  0xa2   : > { %p1131_p5 = pneg %p1130_p3 }
  0xa3   : > { %p1137_p10 = por %p1136_p6, %p1135_p11 }
  0xa5   : > { %p1138_p0 = pnand %p1137_p10, %p1131_p5 }
  0xa7   : > { %1141 = shalt.err (!%p1138_p0)
}
  0xa8   : > { %s1142_s23 = scalar_lea.vmem %s426_s13, 128  ;;  %s1240_s24 = smov [#allocation12]  }
  0xa9   : > { %p1143_p13 = scmp.ne.s32.totalorder %s426_s13, %s1142_s23  ;;  %s1147_s3 = sshll.u32 %s1240_s24, 4  ;;  %s1148_s3 = int_to_ptr.vmem [resolvable:$false] %s1147_s3 }
  0xaa   : > { %s1149_s10 = scalar_lea.vmem %s1148_s3, 256  ;;  %p1150_p2 = scmp.lt.s32.totalorder %s426_s13, %s1148_s3 }
  0xab   : > { %p1145_p1 = pnand %p1143_p13, %p1371_p12  ;;  %p1151_p3 = scmp.lt.s32.totalorder %s1149_s10, %s1142_s23 }
  0xad   : > { %p1146_p7 = pneg %p1145_p1  ;;  %p1152_p9 = por %p1151_p3, %p1150_p2 }
  0xaf   : > { %p1153_p4 = pnand %p1152_p9, %p1146_p7 }
  0xb1   : > { %1156 = shalt.err (!%p1153_p4)
}
  0xb2   : > { %p1648_p8 = scmp.ne.s32.totalorder %s1636_s26, 0  ;;  %p1649_p5 = scmp.ne.s32.totalorder %s1641_s21, 0 }
  0xb3   : > { %s436_s20 = sand.u32 (!%p1649_p5), 1, %s1225_s14   ;;  %p1650_p12 = scmp.ne.s32.totalorder (!%p1649_p5), %s1635_s22, 0 }
  0xb4   : > { %939 = dma.hbm_to_vmem [thread:$0]  (!%p1648_p8), %s1511_s15, 128, %s426_s13, %s415_s29  }
  0xb5   : > { %434 = sbr.rel (%p1649_p5) target bundleno = 485 (0x1e5), region = 60  ;;  %s1535_s18 = sshll.u32 (!%p1649_p5), %s436_s20, 3 }
  0xb6   : > { %s437_s12 = scalar_lea.sflag (!%p1649_p5), [#allocation4], %s436_s20  ;;  %s440_s16 = scalar_lea.vmem (!%p1649_p5), [#allocation3], %s1535_s18 }
  0xbc   : > { %1200 = dma.done.wait (%p1650_p12), %s437_s12, 128  }
  0xbd   : > { %1202 = vsyncadd (%p1650_p12), %s437_s12, 4294967168  ;;  %s445_s26 = sand.u32 1, %s1317_s17   ;;  %s449_s21 = scalar_lea.vmem [#allocation6], %s1535_s18 }
  0xbe   : > { %s446_s15 = scalar_lea.sflag [#allocation7], %s445_s26 }
  0xbf   : > { %1204 = dma.done.wait (%p1650_p12), %s446_s15, 256  }
  0xc0   : > { %1206 = vsyncadd (%p1650_p12), %s446_s15, 4294967040  ;;  %s458_s28 = scalar_lea.vmem [#allocation8], %s1535_s18  ;;  %s464_s13 = scalar_lea.sflag [#allocation10], %s445_s26 }
  0xc1   : > { %s467_s29 = scalar_lea.vmem [#allocation9], %s1535_s18 }
  0xc2   : > { %1208 = dma.done.wait (%p1650_p12), %s464_s13, 256  }
  0xc3   : > { %1210 = vsyncadd (%p1650_p12), %s464_s13, 4294967040  ;;  %s476_s1 = scalar_lea.vmem [#allocation11], %s1535_s18  ;;  %s482_s11 = scalar_lea.sflag [#allocation13], %s436_s20 }
  0xc4   : > { %s485_s30 = scalar_lea.vmem [#allocation12], %s1535_s18 }
  0xc5   : > { %1212 = dma.done.wait (%p1650_p12), %s482_s11, 128  }
  0xc6   : > { %1214 = vsyncadd (%p1650_p12), %s482_s11, 4294967168  ;;  %p879_p9 = scmp.ne.s32.totalorder %s1317_s17, 0 }
  0xc7   : > { %v1241_v0 = vmov (!%p879_p9), 0.0  }
  0xc8   : > { %545 = sbr.rel (%p879_p9) target bundleno = 207 (0xcf), region = 88  ;;  %546 = vst [vmem:[#allocation2] sm:$0xff] (!%p879_p9), %v1241_v0  ;;  %547 = vst [vmem:[#allocation2 + $0x8] sm:$0xff] (!%p879_p9), %v1241_v0 }
  0xcf PF: > { %v548_v1 = vld [vmem:[%s440_s16] sm:$0xff]  ;;  %v549_v2 = vld [vmem:[%s467_s29] sm:$0xff]  ;;  %p880_p11 = scmp.ne.s32.totalorder %s1317_s17, 3 }
  0xd0   : > { %v551_v3 = vld [vmem:[%s449_s21] sm:$0xff]  ;;  %v554_v4 = vld [vmem:[%s476_s1] sm:$0xff]  ;;  %v599_v22 = vlaneseq (!%p880_p11) }
  0xd1   : > { %v552_v5 = vsub.f32 %v548_v1, %v551_v3  ;;  %v555_v6 = vsub.f32 %v549_v2, %v554_v4  ;;  %v562_v7 = vld [vmem:[%s458_s28] sm:$0xff]  ;;  %v565_v8 = vld [vmem:[%s485_s30] sm:$0xff] }
  0xd2   : > { %v563_v9 = vsub.f32 %v548_v1, %v562_v7  ;;  %v566_v10 = vsub.f32 %v549_v2, %v565_v8  ;;  %v550_v13 = vld [vmem:[#allocation2] sm:$0xff]  ;;  %v561_v17 = vld [vmem:[#allocation2 + $0x8] sm:$0xff]  ;;  %v600_v29 = vshrl.u32 (!%p880_p11), %v599_v22, 7  ;;  %v602_v30 = vand.u32 (!%p880_p11), 127, %v599_v22 }
  0xd3   : > { %v553_v11 = vmul.f32 %v552_v5, %v552_v5  ;;  %v556_v12 = vmul.f32 %v555_v6, %v555_v6  ;;  %v606_v23 = vld [vmem:[%s1616_s6] sm:$0xff] (!%p880_p11) }
  0xd4   : > { %v564_v14 = vmul.f32 %v563_v9, %v563_v9  ;;  %v567_v15 = vmul.f32 %v566_v10, %v566_v10  ;;  %574 = sbr.rel (%p880_p11) target bundleno = 454 (0x1c6), region = 92  ;;  %v881_v24 = vadd.f32 (!%p880_p11), -1.0, %v606_v23  ;;  %v608_v25 = vld [vmem:[%s1618_s8] sm:$0xff] (!%p880_p11)  ;;  %v603_v34 = vmul.u32 (!%p880_p11), 128, %v600_v29 }
  0xd5   : > { %v557_v16 = vadd.f32 %v556_v12, %v553_v11  ;;  %v607_v26 = vld [vmem:[%s1617_s7] sm:$0xff] (!%p880_p11)  ;;  %v883_v31 = vadd.f32 (!%p880_p11), -1.0, %v608_v25  ;;  %v647_v44 = vand.u32 (!%p880_p11), 2147483647, %v606_v23 }
  0xd6   : > { %v568_v18 = vadd.f32 %v567_v15, %v564_v14  ;;  %v609_v27 = vld [vmem:[%s1619_s9] sm:$0xff] (!%p880_p11)  ;;  %v882_v32 = vadd.f32 (!%p880_p11), -1.0, %v607_v26  ;;  %v611_v35 = vand.u32 (!%p880_p11), 2147483647, %v881_v24  ;;  %v604_v37 = vadd.s32 (!%p880_p11), %v603_v34, %v602_v30 }
  0xd7   : > { %v558_v19 = vadd.f32 %v557_v16, %v550_v13  ;;  %v884_v33 = vadd.f32 (!%p880_p11), -1.0, %v609_v27  ;;  %v636_v36 = vand.u32 (!%p880_p11), 2147483647, %v883_v31  ;;  %v673_v46 = vand.u32 (!%p880_p11), 2147483647, %v607_v26 }
  0xd8   : > { %v569_v20 = vadd.f32 %v568_v18, %v561_v17  ;;  %v623_v38 = vand.u32 (!%p880_p11), 2147483647, %v882_v32  ;;  %vm605_vm0 = vcmp.lt.s32.totalorder (!%p880_p11), %v604_v37, 126 }
  0xd9   : > { %559 = vst [vmem:[#allocation2] sm:$0xff] %v558_v19  ;;  %v662_v39 = vand.u32 (!%p880_p11), 2147483647, %v884_v33  ;;  %v612_v40 = vsel (!%p880_p11), %vm605_vm0, %v611_v35, 0.0  ;;  %v637_v41 = vsel (!%p880_p11), %vm605_vm0, %v636_v36, 0.0  ;;  %v648_v45 = vsel (!%p880_p11), %vm605_vm0, %v647_v44, 0.0 }
  0xda   : > { %570 = vst [vmem:[#allocation2 + $0x8] sm:$0xff] %v569_v20  ;;  %613 = vadd.xlane.f32.xlu1 (!%p880_p11), %v612_v40  ;;  %v624_v42 = vsel (!%p880_p11), %vm605_vm0, %v623_v38, 0.0  ;;  %v674_v47 = vsel (!%p880_p11), %vm605_vm0, %v673_v46, 0.0 }
  0xdb   : > { %v663_v43 = vsel %vm605_vm0, %v662_v39, 0.0 }
  0xde   : > { %625 = vadd.xlane.f32.xlu1 %v624_v42 }
  0xe0   : > { %v575_v21 = vld [vmem:[#allocation2] sm:$0xff] }
  0xe1   : > { %576 = vadd.xlane.f32.xlu0 %v575_v21  ;;  %v586_v28 = vld [vmem:[#allocation2 + $0x8] sm:$0xff] }
  0xe2   : > { %649 = vadd.xlane.f32.xlu1 %v648_v45 }
  0xe5   : > { %587 = vadd.xlane.f32.xlu0 %v586_v28 }
  0xe6   : > { %675 = vadd.xlane.f32.xlu1 %v674_v47 }
  0xe9   : > { %638 = vadd.xlane.f32.xlu0 %v637_v41 }
  0xed   : > { %664 = vadd.xlane.f32.xlu0 %v663_v43 }
 0x167   : > { %v614_v57 = vpop.xlane.xlu1 %613 }
 0x168   : > { %v615_v60 = vrot.slane %v614_v57, 4 }
 0x16a   : > { %v616_v0 = vadd.f32 %v615_v60, %v614_v57 }
 0x16b   : > { %v626_v2 = vpop.xlane.xlu1 %625 }
 0x16c   : > { %v617_v5 = vrot.slane %v616_v0, 2  ;;  %v627_v7 = vrot.slane %v626_v2, 4 }
 0x16e   : > { %v577_v48 = vpop.xlane.xlu0 %576  ;;  %v628_v10 = vadd.f32 %v627_v7, %v626_v2  ;;  %v618_v12 = vadd.f32 %v617_v5, %v616_v0 }
 0x16f   : > { %v578_v49 = vrot.slane %v577_v48, 4  ;;  %v650_v13 = vpop.xlane.xlu1 %649 }
 0x170   : > { %v629_v15 = vrot.slane %v628_v10, 2  ;;  %v651_v17 = vrot.slane %v650_v13, 4  ;;  %v619_v18 = vrot.slane %v618_v12, 1 }
 0x171   : > { %v579_v50 = vadd.f32 %v578_v49, %v577_v48 }
 0x172   : > { %v588_v51 = vpop.xlane.xlu0 %587  ;;  %v652_v19 = vadd.f32 %v651_v17, %v650_v13  ;;  %v620_v20 = vadd.f32 %v619_v18, %v618_v12  ;;  %v630_v21 = vadd.f32 %v629_v15, %v628_v10 }
 0x173   : > { %v580_v52 = vrot.slane %v579_v50, 2  ;;  %v589_v53 = vrot.slane %v588_v51, 4  ;;  %v676_v23 = vpop.xlane.xlu1 %675 }
 0x174   : > { %v653_v25 = vrot.slane %v652_v19, 2  ;;  %v677_v26 = vrot.slane %v676_v23, 4  ;;  %v631_v27 = vrot.slane %v630_v21, 1 }
 0x175   : > { %v590_v54 = vadd.f32 %v589_v53, %v588_v51  ;;  %v581_v55 = vadd.f32 %v580_v52, %v579_v50 }
 0x176   : > { %v639_v58 = vpop.xlane.xlu0 %638  ;;  %v678_v28 = vadd.f32 %v677_v26, %v676_v23  ;;  %v632_v29 = vadd.f32 %v631_v27, %v630_v21  ;;  %v654_v30 = vadd.f32 %v653_v25, %v652_v19 }
 0x177   : > { %v591_v56 = vrot.slane %v590_v54, 2  ;;  %v582_v59 = vrot.slane %v581_v55, 1  ;;  %v640_v61 = vrot.slane %v639_v58, 4 }
 0x178   : > { %v679_v33 = vrot.slane %v678_v28, 2  ;;  %v655_v34 = vrot.slane %v654_v30, 1 }
 0x179   : > { %v583_v62 = vadd.f32 %v582_v59, %v581_v55  ;;  %v592_v63 = vadd.f32 %v591_v56, %v590_v54  ;;  %v641_v1 = vadd.f32 %v640_v61, %v639_v58 }
 0x17a   : > { %v665_v3 = vpop.xlane.xlu0 %664  ;;  %v680_v35 = vadd.f32 %v679_v33, %v678_v28  ;;  %v656_v36 = vadd.f32 %v655_v34, %v654_v30 }
 0x17b   : > { %889 = vpush %v583_v62  ;;  %v593_v4 = vrot.slane %v592_v63, 1  ;;  %v642_v6 = vrot.slane %v641_v1, 2  ;;  %v666_v8 = vrot.slane %v665_v3, 4 }
 0x17c   : > { %v681_v38 = vrot.slane %v680_v35, 1 }
 0x17d   : > { %v594_v9 = vadd.f32 %v593_v4, %v592_v63  ;;  %v667_v11 = vadd.f32 %v666_v8, %v665_v3  ;;  %v643_v14 = vadd.f32 %v642_v6, %v641_v1 }
 0x17e   : > { %v682_v39 = vadd.f32 %v681_v38, %v680_v35 }
 0x17f   : > { %891 = vpush %v594_v9  ;;  %v668_v16 = vrot.slane %v667_v11, 2  ;;  %v644_v24 = vrot.slane %v643_v14, 1 }
 0x180   : > { %893 = vpush %v620_v20 }
 0x181   : > { %v669_v22 = vadd.f32 %v668_v16, %v667_v11  ;;  %v645_v31 = vadd.f32 %v644_v24, %v643_v14  ;;  %895 = vpush %v632_v29 }
 0x183   : > { %v670_v32 = vrot.slane %v669_v22, 1  ;;  %897 = vpush %v645_v31 }
 0x184   : > { %899 = vpush %v656_v36 }
 0x185   : > { %v671_v37 = vadd.f32 %v670_v32, %v669_v22 }
 0x187   : > { %901 = vpush %v671_v37 }
 0x188   : > { %903 = vpush %v682_v39 }
 0x1ac   : > { %s890_s20 = spop %889 }
 0x1ad   : > { %s585_s28 = smul.f32 0.1, %s890_s20 }
 0x1b0   : > { %s892_s18 = spop %891 }
 0x1b1   : > { %s894_s12 = spop %893  ;;  %s596_s13 = smul.f32 0.001, %s892_s18 }
 0x1b2   : > { %s896_s16 = spop %895 }
 0x1b3   : > { %s634_s30 = sadd.f32 %s896_s16, %s894_s12 }
 0x1b4   : > { %s898_s26 = spop %897  ;;  %s597_s27 = sadd.f32 %s596_s13, %s585_s28 }
 0x1b5   : > { %s900_s15 = spop %899 }
 0x1b6   : > { %s658_s21 = sadd.f32 %s900_s15, %s898_s26  ;;  %s598_s24 = smul.f32 0.00024414063, %s597_s27 }
 0x1b8   : > { %s902_s29 = spop %901  ;;  %s659_s1 = smul.f32 0.5, %s658_s21 }
 0x1b9   : > { %s904_s11 = spop %903 }
 0x1ba   : > { %s684_s22 = sadd.f32 %s904_s11, %s902_s29 }
 0x1bb   : > { %s660_s19 = sadd.f32 %s659_s1, %s634_s30 }
 0x1bc   : > { %s685_s25 = smul.f32 0.5, %s684_s22 }
 0x1be   : > { %s686_s23 = sadd.f32 %s685_s25, %s660_s19 }
 0x1c0   : > { %s687_s3 = smul.f32 0.007936508, %s686_s23 }
 0x1c2   : > { %s688_s10 = sadd.f32 %s687_s3, %s598_s24 }
 0x1c4   : > { %v689_v40 = vstv %s688_s10 }
 0x1c5   : > { %690 = vst [vmem:[#allocation14] sm:$0xff] %v689_v40 }
 0x1c6 PF: > { %p941_p6 = scmp.eq.s32.totalorder %s1317_s17, 3  ;;  %s1242_s20 = smov [#allocation14]  }
 0x1c7   : > { %s698_s18 = sshll.u32 %s1242_s20, 4  ;;  %s699_s18 = int_to_ptr.vmem [resolvable:$true] %s698_s18 }
 0x1c8   : > { %s1157_s26 = scalar_lea.vmem %s699_s18, 128  ;;  %p1164_p1 = scmp.lt.s32.totalorder %s699_s18, %s699_s18 }
 0x1c9   : > { %p1158_p10 = scmp.ne.s32.totalorder %s699_s18, %s1157_s26  ;;  %p1165_p7 = scmp.lt.s32.totalorder %s1157_s26, %s1157_s26 }
 0x1cb   : > { %p1159_p0 = pnand %p1158_p10, %p941_p6  ;;  %p1166_p2 = por %p1165_p7, %p1164_p1 }
 0x1cd   : > { %p1160_p13 = pneg %p1159_p0 }
 0x1cf   : > { %p1167_p3 = pnand %p1166_p2, %p1160_p13 }
 0x1d1   : > { %1170 = shalt.err (!%p1167_p3)
}
 0x1d2   : > { %s1651_s15 = sld [smem:[#allocation25_spill]] }
 0x1d8   : > { %s1652_s21 = smov %s1651_s15  ;;  %s1171_s28 = scalar_lea.hbm %s1651_s15, 128 }
 0x1d9   : > { %p1172_p4 = scmp.ne.s32.totalorder %s1652_s21, %s1171_s28  ;;  %p1177_p12 = scmp.lt.u32.totalorder %s1171_s28, %s1652_s21 }
 0x1db   : > { %p1173_p8 = pnand %p1172_p4, %p941_p6 }
 0x1dd   : > { %p1174_p5 = pneg %p1173_p8 }
 0x1df   : > { %p1179_p9 = pnand %p1177_p12, %p1174_p5 }
 0x1e1   : > { %1182 = shalt.err (!%p1179_p9)
}
 0x1e2   : > { %918 = dma.vmem_to_hbm [thread:$0]  (%p941_p6), %s699_s18, 128, %s1652_s21, [#allocation5]  }
 0x1e3   : > { %1216 = dma.done.wait (%p941_p6), [#allocation5], 128  }
 0x1e4   : > { %1218 = vsyncadd (%p941_p6), [#allocation5], 4294967168 }
 0x1e5 PF: > { %s1653_s16 = sld [smem:[#allocation21_spill]]  ;;  %s1654_s27 = sld [smem:[#allocation20_spill]] }
 0x1e6   : > { %s1655_s15 = sld [smem:[#allocation22_spill]]  ;;  %s1656_s13 = smov %s1225_s14 }
 0x1eb   : > { %p30_p11 = scmp.ge.s32.totalorder %s1653_s16, 6   ;;  %s1657_s14 = smov %s1654_s27 }
 0x1ed   :  { %32 = sbr.rel (!%p30_p11) target bundleno = 14 (0xe), region = 167 }
 0x1f4   :  { %711 = vsyncpa [#allocation4], 1 }
 0x1f5   :  { %713 = vsyncpa [#allocation4 + $0x1], 1 }
 0x1f6   :  { %714 = vsyncpa [#allocation7], 1 }
 0x1f7   :  { %716 = vsyncpa [#allocation7 + $0x1], 1 }
 0x1f8   :  { %717 = vsyncpa [#allocation10], 1 }
 0x1f9   :  { %719 = vsyncpa [#allocation10 + $0x1], 1 }
 0x1fa   :  { %720 = vsyncpa [#allocation13], 1 }
 0x1fb   :  { %722 = vsyncpa [#allocation13 + $0x1], 1 }
 0x1fc   :  { %723 = vsyncpa [#allocation5], 1 }
 0x1fd   :  { %725 = vsyncpa [#allocation5 + $0x1], 1 }

</bundles_post_ra>
